<compile_context>
chip_gen: v7x
topology: tpu7x:2x2x1
jax: 0.10.0
libtpu: 0.0.40
codegen_flags: <defaults>
</compile_context>

<pallas_src>
import jax
import jax.numpy as jnp
from jax.experimental import pallas as pl
from jax.experimental.pallas import tpu as pltpu


def _round_up(a, b):
    return ((a + b - 1) // b) * b


def _make_readout_kernel(n_heads, head_width):
    """Kernel over one folded row-tile of x, fused over all readout heads.

    Ref order:
      x_view [r, W], W1_all [W, W*P], b1_all [1, W*P],
      W2_sel_0..P-1 [W, fold], b2_all (SMEM, [P]), out_0..P-1 [r, fold].
    """

    def kernel(*refs):
        x_ref, w1_ref, b1_ref = refs[0], refs[1], refs[2]
        w2_refs = refs[3:3 + n_heads]
        b2_ref = refs[3 + n_heads]
        out_refs = refs[4 + n_heads:]

        x = x_ref[...]                                        # [r, W] (f32 or bf16)
        # Layer 1 for ALL heads in one MXU matmul, f32 accumulation.
        h = jnp.dot(x, w1_ref[...], preferred_element_type=jnp.float32)
        h = h + b1_ref[...]
        h = h * jax.nn.sigmoid(h)                             # SiLU
        for p in range(n_heads):
            hp = h[:, p * head_width:(p + 1) * head_width]    # aligned lane slice
            # Layer 2 on the MXU against a block-diag selector -> (r, fold) slab
            # (lane-dense-ish 2-D store; unfolded in the wrapper for free).
            y = jnp.dot(hp, w2_refs[p][...], preferred_element_type=jnp.float32)
            y = y + b2_ref[p]                                 # scalar bias from SMEM
            out_refs[p][...] = y.astype(out_refs[p].dtype)

    return kernel


def fused_readout_pallas(x, head_params, b2_all, *, atoms_per_tile=32768):
    """Fused readout for P heads sharing the same input.

    x:           [n_atoms, n_dim]  (use bf16 upstream storage for the HBM win)
    head_params: list of (w1 [n_dim,n_dim] (in,out), b1 [1,n_dim], w2_row [1,n_dim])
    b2_all:      [P] f32 scalars (one per head)
    returns:     tuple of P arrays, each [n_atoms], dtype of x
    """
    n_atoms, n_dim = x.shape
    n_heads = len(head_params)
    itemsize = jnp.dtype(x.dtype).itemsize

    # ---- fold several atoms per 128-lane row (free, contiguous metadata reshape).
    fold = 1
    for f in range(max(1, 128 // n_dim), 0, -1):
        if n_atoms % f == 0 and n_dim * f <= 128:
            fold = f
            break
    n_rows = n_atoms // fold
    width = n_dim * fold
    x_view = x.reshape(n_rows, width)            # no copy: row-major contiguous

    # ---- fold / fuse the (tiny) weights once per call.
    eye_f = jnp.eye(fold, dtype=jnp.float32)
    w1_blocks, b1_rows, w2_sels = [], [], []
    for (w1, b1, w2_row) in head_params:
        w1_blocks.append(jnp.kron(eye_f, w1))            # [W, W] block-diagonal
        b1_rows.append(jnp.tile(b1, (1, fold)))          # [1, W]
        w2_sels.append(jnp.kron(eye_f, w2_row.T))        # [W, fold] block-diag selector
    w1_all = jnp.concatenate(w1_blocks, axis=1).astype(x.dtype)    # [W, W*P]
    b1_all = jnp.concatenate(b1_rows, axis=1).astype(jnp.float32)  # [1, W*P]
    b2_all = b2_all.astype(jnp.float32)

    # ---- rows-per-tile from the per-generation VMEM budget.
    try:
        vmem_cap = int(pltpu.get_tpu_info().vmem_capacity_bytes)
    except Exception:
        vmem_cap = 64 << 20                                   # conservative (v7x)
    vmem_limit = int(min(vmem_cap * 3 // 4, 96 << 20))        # 48 MiB v7x, 96 MiB v5e/v6e

    lane = 128
    per_row_bytes = (2 * max(width, lane) * itemsize          # double-buffered x tile
                     + 3 * max(width * n_heads, lane) * 4     # h + f32 temps
                     + 2 * lane * 4 * n_heads)                # (r, fold) out, lane-padded
    weight_bytes = 2 * width * width * n_heads * itemsize + (64 << 10)
    budget = max(8 * per_row_bytes, vmem_limit * 3 // 4 - weight_bytes)
    r_cap = max(8, min(budget // per_row_bytes, max(1, atoms_per_tile // fold)))

    if n_rows <= r_cap:
        if n_rows >= 2048:
            # Keep >= 2 grid tiles so ("parallel",) can shard across both v7x
            # TensorCores; v5e/v6e (single TC) are unaffected.
            rows = min(n_rows, _round_up(pl.cdiv(n_rows, 2), 8))
        else:
            rows = n_rows                      # single full-extent block
    else:
        rows = max(8, (r_cap // 8) * 8)
    grid = (pl.cdiv(n_rows, rows),)            # ragged last block: writes masked

    # ---- specs.
    in_specs = [
        pl.BlockSpec((rows, width), lambda i: (i, 0)),                 # x (streamed)
        pl.BlockSpec((width, width * n_heads), lambda i: (0, 0)),      # W1_all (resident)
        pl.BlockSpec((1, width * n_heads), lambda i: (0, 0)),          # b1_all
    ]
    in_specs += [pl.BlockSpec((width, fold), lambda i: (0, 0))
                 for _ in range(n_heads)]                              # W2 selectors
    in_specs.append(pl.BlockSpec(memory_space=pltpu.MemorySpace.SMEM))  # b2 scalars

    out_specs = [pl.BlockSpec((rows, fold), lambda i: (i, 0)) for _ in range(n_heads)]
    out_shape = tuple(jax.ShapeDtypeStruct((n_rows, fold), x.dtype)
                      for _ in range(n_heads))

    cost = pl.CostEstimate(
        flops=2 * n_atoms * n_dim * (n_dim + 1) * n_heads,
        transcendentals=n_atoms * n_dim * n_heads,
        bytes_accessed=(n_atoms * n_dim * itemsize
                        + width * width * n_heads * itemsize
                        + n_atoms * 4 * n_heads))

    outs = pl.pallas_call(
        _make_readout_kernel(n_heads, width),
        out_shape=out_shape,
        grid_spec=pltpu.PrefetchScalarGridSpec(
            num_scalar_prefetch=0,
            grid=grid,
            in_specs=in_specs,
            out_specs=out_specs,
        ),
        compiler_params=pltpu.CompilerParams(
            dimension_semantics=("parallel",),
            vmem_limit_bytes=vmem_limit),
        cost_estimate=cost,
    )(x_view, w1_all, b1_all, *w2_sels, b2_all)

    if not isinstance(outs, (list, tuple)):
        outs = (outs,)
    # (n_rows, fold) -> (n_atoms,): free contiguous reshape; no pad, no slice.
    return tuple(o.reshape(n_atoms) for o in outs)


class ReadoutLayer:
    """JAX/Pallas port of hotpp ReadoutLayer (ELEMENT_MODE='none', way=0, SiLU)."""

    def __init__(self, n_dim, target_way={'site_energy': 0}, activate_fn='silu',
                 key=jax.random.PRNGKey(0), atoms_per_tile=32768):
        if activate_fn != 'silu':
            # TODO(synk): other TensorActivate functions not implemented.
            raise NotImplementedError("only silu activation implemented")
        self.n_dim = n_dim
        self.target_way = dict(target_way)
        self.atoms_per_tile = atoms_per_tile
        self.params = {}
        for prop, way in self.target_way.items():
            if way != 0:
                # TODO(synk): way>0 readouts (no bias, equivariant activation) unsupported.
                raise NotImplementedError("only way=0 readout implemented")
            key, k1, k2, k3, k4 = jax.random.split(key, 5)
            bound = 1.0 / jnp.sqrt(n_dim)
            # nn.Linear-style uniform init; W1 stored [in, out], W2 stored as a row.
            w1 = jax.random.uniform(k1, (n_dim, n_dim), jnp.float32, -bound, bound)
            b1 = jax.random.uniform(k2, (1, n_dim), jnp.float32, -bound, bound)
            w2 = jax.random.uniform(k3, (1, n_dim), jnp.float32, -bound, bound)
            b2 = jax.random.uniform(k4, (), jnp.float32, -bound, bound)
            self.params[prop] = (w1, b1, w2, b2)

    def __call__(self, input_tensors, batch_data=None):
        props = list(self.target_way.keys())
        # All supported heads read input_tensors[0] (way=0); fuse them into a
        # single pallas_call so x is streamed from HBM exactly once.
        head_params = [self.params[p][:3] for p in props]
        b2_all = jnp.stack([self.params[p][3] for p in props])
        ys = fused_readout_pallas(input_tensors[0], head_params, b2_all,
                                  atoms_per_tile=self.atoms_per_tile)
        return {p: y for p, y in zip(props, ys)}


def _reference(x, params):
    """Plain-JAX reference of the same math (f32)."""
    w1, b1, w2_row, b2 = params
    xf = x.astype(jnp.float32)
    h = xf @ w1 + b1
    h = h * jax.nn.sigmoid(h)
    return h @ w2_row[0] + b2


if __name__ == "__main__":
    key = jax.random.PRNGKey(0)
    k1, k2, k3, kp1, kp2, kp3 = jax.random.split(key, 6)
    n_dim = 32

    # --- Check 1: default config, single head, 64 atoms (fold=4, single tile).
    x = jax.random.normal(k1, (64, n_dim), jnp.float32)
    layer = ReadoutLayer(n_dim=n_dim, target_way={'site_energy': 0}, key=kp1)
    out = layer({0: x}, batch_data={})
    energies = jax.block_until_ready(out['site_energy'])
    ref = _reference(x, layer.params['site_energy'])
    assert energies.shape == (64,)
    assert jnp.allclose(energies, ref, atol=1e-5, rtol=1e-5)

    # --- Check 2: two fused heads, 300 atoms, tiny tile -> multi-tile ragged grid.
    x2 = jax.random.normal(k2, (300, n_dim), jnp.float32)
    layer2 = ReadoutLayer(n_dim=n_dim,
                          target_way={'site_energy': 0, 'charge': 0},
                          key=kp2, atoms_per_tile=128)
    out2 = layer2({0: x2}, batch_data={})
    jax.block_until_ready(out2['charge'])
    for prop in ('site_energy', 'charge'):
        ref2 = _reference(x2, layer2.params[prop])
        assert out2[prop].shape == (300,)
        assert jnp.allclose(out2[prop], ref2, atol=1e-5, rtol=1e-5)

    # --- Check 3: odd / even-only atom counts exercise fold=1 and fold=2 paths
    #     (still no padding / extra HBM passes over x).
    for n_r in (107, 106):
        x3 = jax.random.normal(k3, (n_r, n_dim), jnp.float32)
        layer3 = ReadoutLayer(n_dim=n_dim, target_way={'site_energy': 0}, key=kp3)
        out3 = layer3({0: x3}, batch_data={})
        e3 = jax.block_until_ready(out3['site_energy'])
        ref3 = _reference(x3, layer3.params['site_energy'])
        assert e3.shape == (n_r,)
        assert jnp.allclose(e3, ref3, atol=1e-5, rtol=1e-5)

    # --- Check 4: upstream bf16 activations (bandwidth opt on all gens);
    #     W1 cast to bf16 in the wrapper, f32 MXU accumulation inside the kernel.
    x_bf16 = x.astype(jnp.bfloat16)
    out_bf16 = layer({0: x_bf16}, batch_data={})
    e_bf16 = jax.block_until_ready(out_bf16['site_energy']).astype(jnp.float32)
    assert jnp.allclose(e_bf16, ref, atol=5e-2, rtol=5e-2)

    print("KERNEL_OK")
</pallas_src>

<mosaic_0001>
module attributes {stable_mosaic.version = 11 : i64} {
  func.func @kernel(%arg0: i32, %arg1: memref<16x128xf32, #tpu.memory_space<vmem>>, %arg2: memref<128x128xf32, #tpu.memory_space<vmem>>, %arg3: memref<1x128xf32, #tpu.memory_space<vmem>>, %arg4: memref<128x4xf32, #tpu.memory_space<vmem>>, %arg5: memref<1xf32, #tpu.memory_space<smem>>, %arg6: memref<16x4xf32, #tpu.memory_space<vmem>>) attributes {dimension_semantics = [#tpu.dimension_semantics<parallel>], iteration_bounds = array<i64: 1>, scalar_prefetch = 0 : i64, scratch_operands = 0 : i64, tpu.core_type = #tpu.core_type<tc>, window_params = [{transform_indices = @transform_0, window_bounds = array<i64: 16, 128>}, {pipeline_mode = #tpu.pipeline_mode<synchronous>, transform_indices = @transform_1, window_bounds = array<i64: 128, 128>}, {pipeline_mode = #tpu.pipeline_mode<synchronous>, transform_indices = @transform_2, window_bounds = array<i64: 1, 128>}, {pipeline_mode = #tpu.pipeline_mode<synchronous>, transform_indices = @transform_3, window_bounds = array<i64: 128, 4>}, {transform_indices = @transform_4, window_bounds = array<i64: 1>}, {transform_indices = @transform_5, window_bounds = array<i64: 16, 4>}]} {
    %c0 = arith.constant 0 : index
    %c0_0 = arith.constant 0 : index
    %0 = vector.load %arg1[%c0, %c0_0] : memref<16x128xf32, #tpu.memory_space<vmem>>, vector<16x128xf32>
    %c0_1 = arith.constant 0 : index
    %c0_2 = arith.constant 0 : index
    %1 = vector.load %arg2[%c0_1, %c0_2] : memref<128x128xf32, #tpu.memory_space<vmem>>, vector<128x128xf32>
    %cst = arith.constant dense<0.000000e+00> : vector<16x128xf32>
    %2 = tpu.matmul %0, %1, %cst {dimension_numbers = #tpu.dot_dimension_numbers<[1], [0], [0], [1], [0, 0, 1, 1], [], []>} : vector<16x128xf32>, vector<128x128xf32>, vector<16x128xf32> -> vector<16x128xf32>
    %c0_3 = arith.constant 0 : index
    %c0_4 = arith.constant 0 : index
    %3 = vector.load %arg3[%c0_3, %c0_4] : memref<1x128xf32, #tpu.memory_space<vmem>>, vector<1x128xf32>
    %4 = vector.broadcast %3 : vector<1x128xf32> to vector<16x128xf32>
    %5 = arith.addf %2, %4 : vector<16x128xf32>
    %6 = arith.negf %5 : vector<16x128xf32>
    %7 = math.exp %6 : vector<16x128xf32>
    %cst_5 = arith.constant 1.000000e+00 : f32
    %8 = vector.broadcast %cst_5 : f32 to vector<16x128xf32>
    %9 = arith.addf %8, %7 : vector<16x128xf32>
    %10 = arith.divf %8, %9 : vector<16x128xf32>
    %11 = arith.mulf %5, %10 : vector<16x128xf32>
    %c0_6 = arith.constant 0 : index
    %c0_7 = arith.constant 0 : index
    %12 = vector.load %arg4[%c0_6, %c0_7] : memref<128x4xf32, #tpu.memory_space<vmem>>, vector<128x4xf32>
    %cst_8 = arith.constant dense<0.000000e+00> : vector<16x4xf32>
    %13 = tpu.matmul %11, %12, %cst_8 {dimension_numbers = #tpu.dot_dimension_numbers<[1], [0], [0], [1], [0, 0, 1, 1], [], []>} : vector<16x128xf32>, vector<128x4xf32>, vector<16x4xf32> -> vector<16x4xf32>
    %c0_9 = arith.constant 0 : index
    %14 = memref.load %arg5[%c0_9] : memref<1xf32, #tpu.memory_space<smem>>
    %15 = vector.broadcast %14 : f32 to vector<16x4xf32>
    %16 = arith.addf %13, %15 : vector<16x4xf32>
    %c0_10 = arith.constant 0 : index
    %c0_11 = arith.constant 0 : index
    %17 = vector.load %arg6[%c0_10, %c0_11] : memref<16x4xf32, #tpu.memory_space<vmem>>, vector<16x4xf32>
    tpu.vector_store %arg6[%c0_10, %c0_11], %16 {strides = array<i32>} : memref<16x4xf32, #tpu.memory_space<vmem>>, vector<16x4xf32>,
    return
  }
  func.func @transform_0(%arg0: i32) -> (i32, i32) {
    %c0_i32 = arith.constant 0 : i32
    %c0_i32_0 = arith.constant 0 : i32
    return %arg0, %c0_i32 : i32, i32
  }
  func.func @transform_1(%arg0: i32) -> (i32, i32) {
    %c0_i32 = arith.constant 0 : i32
    %c0_i32_0 = arith.constant 0 : i32
    %c0_i32_1 = arith.constant 0 : i32
    return %c0_i32, %c0_i32_0 : i32, i32
  }
  func.func @transform_2(%arg0: i32) -> (i32, i32) {
    %c0_i32 = arith.constant 0 : i32
    %c0_i32_0 = arith.constant 0 : i32
    %c0_i32_1 = arith.constant 0 : i32
    return %c0_i32, %c0_i32_0 : i32, i32
  }
  func.func @transform_3(%arg0: i32) -> (i32, i32) {
    %c0_i32 = arith.constant 0 : i32
    %c0_i32_0 = arith.constant 0 : i32
    %c0_i32_1 = arith.constant 0 : i32
    return %c0_i32, %c0_i32_0 : i32, i32
  }
  func.func @transform_4(%arg0: i32) -> i32 {
    %c0_i32 = arith.constant 0 : i32
    %c0_i32_0 = arith.constant 0 : i32
    return %c0_i32 : i32
  }
  func.func @transform_5(%arg0: i32) -> (i32, i32) {
    %c0_i32 = arith.constant 0 : i32
    %c0_i32_0 = arith.constant 0 : i32
    return %arg0, %c0_i32 : i32, i32
  }
}

</mosaic_0001>

<bundles_post_ra>
// kernel: tpu_custom_call.1
= control target key start
LH: loop header
LB: loop body
LE: loop exit
PB: predicated region body
PF: predicated region fallthrough
CT: control target
= control target key end

     0   :  { %11 = vsyncpa [#allocation4], 0  ;;  %s458_s18 = smov [#allocation3]   ;;  %s611_s0 = inlined_call_operand.hbm [shape: f32[16,128], index: 0, kind: input, shape index: {}]   ;;  %s612_s1 = inlined_call_operand.vmem [shape: f32[128,128], index: 1, kind: input, shape index: {}]   ;;  %s613_s2 = inlined_call_operand.vmem [shape: f32[1,128], index: 2, kind: input, shape index: {}]   ;;  %s614_s3 = inlined_call_operand.vmem [shape: f32[128,4], index: 3, kind: input, shape index: {}]   ;;  %s615_s4 = inlined_call_operand.<no memory space> [shape: f32[1], index: 4, kind: input, shape index: {}]   ;;  %s616_s5 = inlined_call_operand.vmem [shape: f32[16,4], index: 5, kind: output, shape index: {}]  }
   0x1   :  { %s17_s19 = sshll.u32 %s458_s18, 4  ;;  %s434_s22 = scalar_lea.hbm %s611_s0, 256  ;;  %s18_s19 = int_to_ptr.vmem [resolvable:$true] %s17_s19 }
   0x2   :  { %p435_p0 = scmp.ne.s32.totalorder %s611_s0, %s434_s22  ;;  %p438_p1 = scmp.lt.u32.totalorder %s434_s22, %s611_s0 }
   0x4   :  { %p440_p2 = pnand %p438_p1, %p435_p0 }
   0x6   :  { %443 = shalt.err (!%p440_p2)
}
   0x7   :  { %s444_s27 = scalar_lea.vmem %s18_s19, 256  ;;  %p449_p4 = scmp.lt.s32.totalorder %s18_s19, %s18_s19 }
   0x8   :  { %p445_p3 = scmp.ne.s32.totalorder %s18_s19, %s444_s27  ;;  %p450_p5 = scmp.lt.s32.totalorder %s444_s27, %s444_s27 }
   0xa   :  { %p451_p6 = por %p450_p5, %p449_p4 }
   0xc   :  { %p452_p7 = pnand %p451_p6, %p445_p3 }
   0xe   :  { %455 = shalt.err (!%p452_p7)
}
   0xf   :  { %s459_s28 = smov 128   ;;  %s460_s29 = smov 8  }
  0x10   :  { %23 = dma.hbm_to_vmem [thread:$0]  %s611_s0, 256, %s18_s19, [#allocation4], %s459_s28, %s459_s28, %s460_s29  }
  0x11   :  { %456 = dma.done.wait [#allocation4], 256  }
  0x12   :  { %457 = vsyncadd [#allocation4], 4294967040  ;;  %v37_v0 = vld [vmem:[%s612_s1] sm:$0xff]  ;;  %v38_v1 = vld [vmem:[%s612_s1 + $0x8] sm:$0xff]  ;;  %vm242_vm0 = vcmask 31744  }
  0x13   :  { %v39_v2 = vld [vmem:[%s612_s1 + $0x10] sm:$0xff]  ;;  %v359_v3 = vpack.c.bf16 %v38_v1, %v37_v0  ;;  %v40_v4 = vld [vmem:[%s612_s1 + $0x18] sm:$0xff]  ;;  %v41_v6 = vld [vmem:[%s612_s1 + $0x20] sm:$0xff]  ;;  %v166_v1 = vstv %s615_s4 }
  0x14   :  { %v363_v5 = vpack.c.bf16 %v40_v4, %v39_v2  ;;  %v42_v7 = vld [vmem:[%s612_s1 + $0x28] sm:$0xff]  ;;  %v35_v9 = vld [vmem:[#allocation3] sm:$0xff]  ;;  %v43_v10 = vld [vmem:[%s612_s1 + $0x30] sm:$0xff] }
  0x15   :  { %360 = vmatprep.subr.bf16.mxu0 %v359_v3  ;;  %v367_v8 = vpack.c.bf16 %v42_v7, %v41_v6  ;;  %v44_v11 = vld [vmem:[%s612_s1 + $0x38] sm:$0xff]  ;;  %321 = vmatprep.mubr.f32.mxu0 %v35_v9  ;;  %v45_v13 = vld [vmem:[%s612_s1 + $0x40] sm:$0xff]  ;;  %v46_v14 = vld [vmem:[%s612_s1 + $0x48] sm:$0xff] }
  0x16   :  { %362 = vmatpush3.bf16.msra.mxu0 %v359_v3  ;;  %v371_v12 = vpack.c.bf16 %v44_v11, %v43_v10  ;;  %v375_v15 = vpack.c.bf16 %v46_v14, %v45_v13  ;;  %v47_v16 = vld [vmem:[%s612_s1 + $0x50] sm:$0xff]  ;;  %v48_v17 = vld [vmem:[%s612_s1 + $0x58] sm:$0xff]  ;;  %v49_v19 = vld [vmem:[%s612_s1 + $0x60] sm:$0xff] }
  0x17   :  { %364 = vmatprep.subr.bf16.mxu0 %v363_v5  ;;  %v379_v18 = vpack.c.bf16 %v48_v17, %v47_v16  ;;  %v50_v20 = vld [vmem:[%s612_s1 + $0x68] sm:$0xff]  ;;  %v51_v22 = vld [vmem:[%s612_s1 + $0x70] sm:$0xff]  ;;  %v52_v23 = vld [vmem:[%s612_s1 + $0x78] sm:$0xff] }
  0x18   :  { %v383_v21 = vpack.c.bf16 %v50_v20, %v49_v19  ;;  %v387_v24 = vpack.c.bf16 %v52_v23, %v51_v22  ;;  %v36_v25 = vld [vmem:[#allocation3 + $0x8] sm:$0xff]  ;;  %v149_v26 = vld [vmem:[%s614_s3] sm:$0xff]  ;;  %v151_v29 = vld [vmem:[%s614_s3 + $0x10] sm:$0xff] }
  0x19   :  { %v150_v27 = vld [vmem:[%s614_s3 + $0x8] sm:$0xff]  ;;  %v152_v30 = vld [vmem:[%s614_s3 + $0x18] sm:$0xff]  ;;  %v153_v32 = vld [vmem:[%s614_s3 + $0x20] sm:$0xff] }
  0x1a   :  { %366 = vmatpush3.bf16.msra.mxu0 %v363_v5  ;;  %v391_v28 = vpack.c.bf16 %v150_v27, %v149_v26  ;;  %v395_v31 = vpack.c.bf16 %v152_v30, %v151_v29  ;;  %v154_v33 = vld [vmem:[%s614_s3 + $0x28] sm:$0xff]  ;;  %v155_v35 = vld [vmem:[%s614_s3 + $0x30] sm:$0xff]  ;;  %v156_v36 = vld [vmem:[%s614_s3 + $0x38] sm:$0xff] }
  0x1b   :  { %368 = vmatprep.subr.bf16.mxu0 %v367_v8  ;;  %v399_v34 = vpack.c.bf16 %v154_v33, %v153_v32  ;;  %v403_v37 = vpack.c.bf16 %v156_v36, %v155_v35  ;;  %v157_v38 = vld [vmem:[%s614_s3 + $0x40] sm:$0xff]  ;;  %v158_v39 = vld [vmem:[%s614_s3 + $0x48] sm:$0xff]  ;;  %v159_v41 = vld [vmem:[%s614_s3 + $0x50] sm:$0xff] }
  0x1c   :  { %392 = vmatprep.subr.bf16.mxu1 %v391_v28  ;;  %v407_v40 = vpack.c.bf16 %v158_v39, %v157_v38  ;;  %v160_v42 = vld [vmem:[%s614_s3 + $0x58] sm:$0xff]  ;;  %v161_v44 = vld [vmem:[%s614_s3 + $0x60] sm:$0xff]  ;;  %v162_v45 = vld [vmem:[%s614_s3 + $0x68] sm:$0xff] }
  0x1d   :  { %394 = vmatpush3.bf16.msra.mxu1 %v391_v28  ;;  %v411_v43 = vpack.c.bf16 %v160_v42, %v159_v41  ;;  %v415_v46 = vpack.c.bf16 %v162_v45, %v161_v44  ;;  %v163_v47 = vld [vmem:[%s614_s3 + $0x70] sm:$0xff]  ;;  %v164_v48 = vld [vmem:[%s614_s3 + $0x78] sm:$0xff]  ;;  %v250_v50 = vld [vmem:[%s613_s2] ss:$0 sm:$0xff] }
  0x1e   :  { %370 = vmatpush3.bf16.msra.mxu0 %v367_v8  ;;  %396 = vmatprep.subr.bf16.mxu1 %v395_v31  ;;  %v419_v49 = vpack.c.bf16 %v164_v48, %v163_v47 }
  0x1f   :  { %372 = vmatprep.subr.bf16.mxu0 %v371_v12 }
  0x21   :  { %398 = vmatpush3.bf16.msra.mxu1 %v395_v31 }
  0x22   :  { %374 = vmatpush3.bf16.msra.mxu0 %v371_v12  ;;  %400 = vmatprep.subr.bf16.mxu1 %v399_v34 }
  0x23   :  { %376 = vmatprep.subr.bf16.mxu0 %v375_v15 }
  0x25   :  { %402 = vmatpush3.bf16.msra.mxu1 %v399_v34 }
  0x26   :  { %378 = vmatpush3.bf16.msra.mxu0 %v375_v15  ;;  %404 = vmatprep.subr.bf16.mxu1 %v403_v37 }
  0x27   :  { %380 = vmatprep.subr.bf16.mxu0 %v379_v18 }
  0x29   :  { %406 = vmatpush3.bf16.msra.mxu1 %v403_v37 }
  0x2a   :  { %382 = vmatpush3.bf16.msra.mxu0 %v379_v18  ;;  %408 = vmatprep.subr.bf16.mxu1 %v407_v40 }
  0x2b   :  { %384 = vmatprep.subr.bf16.mxu0 %v383_v21 }
  0x2d   :  { %410 = vmatpush3.bf16.msra.mxu1 %v407_v40 }
  0x2e   :  { %386 = vmatpush3.bf16.msra.mxu0 %v383_v21  ;;  %412 = vmatprep.subr.bf16.mxu1 %v411_v43 }
  0x2f   :  { %388 = vmatprep.subr.bf16.mxu0 %v387_v24 }
  0x31   :  { %414 = vmatpush3.bf16.msra.mxu1 %v411_v43 }
  0x32   :  { %390 = vmatpush3.bf16.msra.mxu0 %v387_v24  ;;  %416 = vmatprep.subr.bf16.mxu1 %v415_v46 }
  0x35   :  { %322 = vmatmul.mubr.f32.vlgmr.msra.gmra.mrb[0].mxu0 %v36_v25  ;;  %418 = vmatpush3.bf16.msra.mxu1 %v415_v46 }
  0x36   :  { %420 = vmatprep.subr.bf16.mxu1 %v419_v49 }
  0x39   :  { %422 = vmatpush3.bf16.msra.mxu1 %v419_v49 }
 0x108   :  { %v323_v51 = vpop.f32.mrb[0].mxu0 }
 0x109   :  { %v132_v52 = vadd.f32 %v323_v51, %v250_v50  ;;  %v126_v53 = vpop.f32.mrb[1].mxu0 }
 0x10a   :  { %v127_v54 = vadd.f32 %v250_v50, %v126_v53 }
 0x10b   :  { %v252_v55 = vmul.f32 -1.442695, %v132_v52 }
 0x10c   :  { %v251_v56 = vmul.f32 -1.442695, %v127_v54 }
 0x10d   :  { %426 = vpow2.f32 %v252_v55 }
 0x10e   :  { %428 = vpow2.f32 %v251_v56 }
 0x117   :  { %v427_v57 = vpop.eup %426 }
 0x118   :  { %v429_v58 = vpop.eup %428  ;;  %v142_v59 = vadd.f32 1.0, %v427_v57 }
 0x119   :  { %v141_v60 = vadd.f32 1.0, %v429_v58 }
 0x11a   :  { %430 = vrcp.f32 %v142_v59 }
 0x11b   :  { %432 = vrcp.f32 %v141_v60 }
 0x124   :  { %v431_v61 = vpop.eup %430 }
 0x125   :  { %v433_v62 = vpop.eup %432  ;;  %v148_v0 = vmul.f32 %v431_v61, %v132_v52 }
 0x126   :  { %v147_v63 = vmul.f32 %v433_v62, %v127_v54 }
 0x128   :  { %356 = vmatprep.mubr.f32.mxu1 %v147_v63 }
 0x129   :  { %357 = vmatmul.mubr.f32.vlgmr.msra.gmra.mrb[0].mxu1 %v148_v0 }
 0x1fc   :  { %v358_v2 = vpop.f32.mrb[0].mxu1 }
 0x1fd   :  { %v239_v3 = vadd.f32 %v358_v2, %v166_v1  ;;  %v233_v4 = vpop.f32.mrb[1].mxu1 }
 0x1fe   :  { %v234_v5 = vadd.f32 %v233_v4, %v166_v1 }
 0x1ff   :  { %244 = vst.msk [vmem:[%s616_s5 + $0x8] sm:$0xff] %vm242_vm0, %v239_v3 }
 0x200   :  { %243 = vst.msk [vmem:[%s616_s5] sm:$0xff] %vm242_vm0, %v234_v5 }
 0x201   :  { %249 = vsyncpa [#allocation4], 1 }

</bundles_post_ra>
